<compile_context>
chip_gen: v7x
topology: tpu7x:2x2x1
jax: 0.10.0
libtpu: 0.0.40
codegen_flags: <defaults>
</compile_context>

<pallas_src>
import functools

import jax
import jax.numpy as jnp
from jax.experimental import pallas as pl
from jax.experimental.pallas import tpu as pltpu

LANE = 128
SUBLANE = 8
ROW_ALIGN = 32        # rows per tile: multiple of 32 -> native tiling for f32/bf16/i8
CHUNK_ROWS = 256      # fused softmax+accumulate chunk (multiple of ROW_ALIGN)


def _dice_sums_kernel(x_ref, t_ref, o_ref, acc_ref, *, num_classes,
                      valid_pixels, tile_rows, needs_mask):
    """Accumulate per-class (intersection, pred_sum, target_sum) lane partials.

    x_ref:   (1, C, R, 128)        logits block (any float dtype)
    t_ref:   (1, R, 128)           integer target-class block
    o_ref:   (1, 1, 3, C-1, 128)   per-(image, split) lane-partial output
    acc_ref: (3, C-1, 8, 128) f32  VMEM accumulator, persists across pixel tiles
    """
    s = pl.program_id(1)
    j = pl.program_id(2)
    num_j = pl.num_programs(2)
    global_j = s * num_j + j                    # pixel-tile index within the image
    tile_pixels = tile_rows * LANE

    @pl.when(j == 0)
    def _init():
        acc_ref[...] = jnp.zeros_like(acc_ref)

    def process(masked):
        # Local (8, 128) vreg accumulators; written back to VMEM once per tile.
        part = [[jnp.zeros((SUBLANE, LANE), jnp.float32)
                 for _ in range(num_classes - 1)] for _ in range(3)]
        for r0 in range(0, tile_rows, CHUNK_ROWS):
            ch = min(CHUNK_ROWS, tile_rows - r0)
            x = x_ref[0, :, pl.ds(r0, ch), :].astype(jnp.float32)   # (C, ch, 128)
            t = t_ref[0, pl.ds(r0, ch), :]                          # (ch, 128)
            # Softmax over the leading class axis: pure VPU/EUP, no XLU traffic.
            x = x - jnp.max(x, axis=0, keepdims=True)
            e = jnp.exp(x)
            p = e * pl.reciprocal(jnp.sum(e, axis=0, keepdims=True), approx=False)
            if masked:
                # NOTE: int32 pixel index — fine for any H*W < 2^31.
                row = jax.lax.broadcasted_iota(jnp.int32, (ch, LANE), 0)
                lane = jax.lax.broadcasted_iota(jnp.int32, (ch, LANE), 1)
                pix = (global_j * tile_rows + r0 + row) * LANE + lane
                valid = (pix < valid_pixels).astype(jnp.float32)
            for c in range(1, num_classes):                 # skip background class 0
                pc = p[c]
                if masked:
                    pc = pc * valid                         # padded targets are class 0,
                tc = (t == c).astype(jnp.float32)           # so only pred needs masking
                k = c - 1
                part[0][k] += jnp.sum(
                    (pc * tc).reshape(ch // SUBLANE, SUBLANE, LANE), axis=0)
                part[1][k] += jnp.sum(
                    pc.reshape(ch // SUBLANE, SUBLANE, LANE), axis=0)
                part[2][k] += jnp.sum(
                    tc.reshape(ch // SUBLANE, SUBLANE, LANE), axis=0)
        for q in range(3):
            for k in range(num_classes - 1):
                acc_ref[q, k] += part[q][k]

    if needs_mask:
        # Only tiles that reach past the valid pixel range pay for the mask.
        has_pad = (global_j + 1) * tile_pixels > valid_pixels

        @pl.when(has_pad)
        def _masked():
            process(True)

        @pl.when(jnp.logical_not(has_pad))
        def _unmasked():
            process(False)
    else:
        process(False)

    @pl.when(j == num_j - 1)
    def _finalize():
        # One cross-sublane reduction per (image, split); lanes reduced in JAX.
        o_ref[0, 0] = jnp.sum(acc_ref[...], axis=2)        # (3, C-1, 128)


def _pick_tiling(rows, num_classes, x_bytes, t_bytes, max_rows):
    """num_tiles and rows-per-tile, bounded by a portable VMEM budget."""
    # Keep the double-buffered input blocks comfortably under the smallest
    # default scoped-VMEM limit across generations (16 MiB on v5e; v7x has only
    # 64 MiB physical VMEM).  Scratch after the accumulator change is negligible.
    budget = 10 * 1024 * 1024
    per_row = 2 * LANE * (num_classes * x_bytes + t_bytes)     # double-buffered
    cap = max(ROW_ALIGN, (budget // per_row) // ROW_ALIGN * ROW_ALIGN)
    max_rows = max(ROW_ALIGN, (min(max_rows, cap) // ROW_ALIGN) * ROW_ALIGN)
    num_tiles = pl.cdiv(rows, max_rows)
    tile_rows = pl.cdiv(pl.cdiv(rows, num_tiles), ROW_ALIGN) * ROW_ALIGN
    return num_tiles, tile_rows


def dice_loss(logits, targets, num_classes=3, max_rows=1024):
    """Pallas implementation of Diceloss.forward.

    logits:  (N, C, H, W) float (f32 or bf16)
    targets: (N, H, W) int
    returns: scalar float32 loss
    """
    N, C, H, W = logits.shape
    assert C == num_classes and num_classes >= 2
    HW = H * W
    rows = pl.cdiv(HW, LANE)

    x_bytes = jnp.dtype(logits.dtype).itemsize
    t_bytes = jnp.dtype(targets.dtype).itemsize
    num_tiles, R = _pick_tiling(rows, num_classes, x_bytes, t_bytes, max_rows)
    rows_pad = num_tiles * R
    pad = rows_pad * LANE - HW
    needs_mask = pad != 0

    # Free reshapes; padding is now bounded to <32 rows per tile.
    # TODO(synk): fuse this pad into the upstream producer to avoid one extra
    # HBM pass on non-aligned spatial sizes.
    x = logits.reshape(N, C, HW)
    t = targets.reshape(N, HW)
    if pad:
        x = jnp.pad(x, ((0, 0), (0, 0), (0, pad)))
        t = jnp.pad(t, ((0, 0), (0, pad)))
    x = x.reshape(N, C, rows_pad, LANE)
    t = t.reshape(N, rows_pad, LANE)

    # Split the pixel-tile range over a second "parallel" axis when the batch
    # axis alone cannot keep both v7x TensorCores busy.
    S = 2 if (N == 1 and num_tiles >= 2 and num_tiles % 2 == 0) else 1
    T = num_tiles // S

    kernel = functools.partial(
        _dice_sums_kernel, num_classes=num_classes, valid_pixels=HW,
        tile_rows=R, needs_mask=needs_mask)

    partials = pl.pallas_call(
        kernel,
        out_shape=jax.ShapeDtypeStruct((N, S, 3, num_classes - 1, LANE),
                                       jnp.float32),
        grid_spec=pltpu.PrefetchScalarGridSpec(
            num_scalar_prefetch=0,
            grid=(N, S, T),
            in_specs=[
                pl.BlockSpec((1, C, R, LANE), lambda n, s, j: (n, 0, s * T + j, 0)),
                pl.BlockSpec((1, R, LANE), lambda n, s, j: (n, s * T + j, 0)),
            ],
            out_specs=pl.BlockSpec((1, 1, 3, num_classes - 1, LANE),
                                   lambda n, s, j: (n, s, 0, 0, 0)),
            scratch_shapes=[
                pltpu.VMEM((3, num_classes - 1, SUBLANE, LANE), jnp.float32)],
        ),
        compiler_params=pltpu.CompilerParams(
            dimension_semantics=("parallel", "parallel", "arbitrary")),
    )(x, t)

    sums = jnp.sum(partials, axis=(0, 1, 4))                 # (3, C-1)
    intersection, pred_sum, target_sum = sums[0], sums[1], sums[2]
    dice = (2.0 * intersection + 1e-07) / (pred_sum + target_sum + 1e-07)
    # sum of (1 - dice) over classes 1..C-1, divided by (num_classes - 1)
    return jnp.mean(1.0 - dice)


def _dice_loss_ref(logits, targets, num_classes=3):
    """Pure-JAX reference mirroring the PyTorch module."""
    pred = jax.nn.softmax(logits.astype(jnp.float32), axis=1)         # (N,C,H,W)
    onehot = jax.nn.one_hot(targets, num_classes, dtype=jnp.float32)  # (N,H,W,C)
    target = jnp.transpose(onehot, (0, 3, 1, 2))                      # (N,C,H,W)
    loss = 0.0
    for c in range(1, num_classes):
        inter = jnp.sum(pred[:, c] * target[:, c])
        union = jnp.sum(pred[:, c]) + jnp.sum(target[:, c])
        dice = (2.0 * inter + 1e-07) / (union + 1e-07)
        loss = loss + (1.0 - dice)
    return loss / (num_classes - 1)


if __name__ == "__main__":
    key = jax.random.PRNGKey(0)
    ks = jax.random.split(key, 8)

    def check(logits, targets, C, max_rows=1024, tol=1e-5):
        out = jax.block_until_ready(
            dice_loss(logits, targets, num_classes=C, max_rows=max_rows))
        ref = jax.block_until_ready(
            _dice_loss_ref(logits.astype(jnp.float32), targets, num_classes=C))
        assert jnp.allclose(out, ref, atol=tol, rtol=tol), (out, ref)

    # 1) Tile-aligned case (no masking code generated), single pixel tile.
    N, C, H, W = 2, 3, 64, 64
    logits = jax.random.normal(ks[0], (N, C, H, W), dtype=jnp.float32)
    targets = jax.random.randint(ks[1], (N, H, W), 0, C, dtype=jnp.int32)
    check(logits, targets, C)

    # 2) Non-aligned spatial size (in-kernel validity mask), single tile.
    logits2 = jax.random.normal(ks[2], (N, C, 10, 10), dtype=jnp.float32)
    targets2 = jax.random.randint(ks[3], (N, 10, 10), 0, C, dtype=jnp.int32)
    check(logits2, targets2, C)

    # 3) Multi-tile + pixel-axis split across cores (N=1), aligned, C=4.
    C3 = 4
    logits3 = jax.random.normal(ks[4], (1, C3, 128, 128), dtype=jnp.float32)
    targets3 = jax.random.randint(ks[5], (1, 128, 128), 0, C3, dtype=jnp.int32)
    check(logits3, targets3, C3, max_rows=32)

    # 4) Multi-tile, non-aligned: mask is runtime-gated to the tail tile only.
    logits4 = jax.random.normal(ks[6], (1, C, 100, 100), dtype=jnp.float32)
    targets4 = jax.random.randint(ks[7], (1, 100, 100), 0, C, dtype=jnp.int32)
    check(logits4, targets4, C, max_rows=32)

    # 5) bf16 logits (roughly halves logits HBM traffic; softmax stays f32 in-kernel).
    check(logits.astype(jnp.bfloat16), targets, C, tol=1e-4)

    print("KERNEL_OK")
</pallas_src>

<mosaic_0001>
module attributes {stable_mosaic.version = 11 : i64} {
  func.func @_dice_sums_kernel(%arg0: i32, %arg1: i32, %arg2: i32, %arg3: memref<1x3x32x128xf32, #tpu.memory_space<vmem>>, %arg4: memref<1x32x128xi32, #tpu.memory_space<vmem>>, %arg5: memref<1x1x3x2x128xf32, #tpu.memory_space<vmem>>, %arg6: memref<3x2x8x128xf32, #tpu.memory_space<vmem>>) attributes {dimension_semantics = [#tpu.dimension_semantics<parallel>, #tpu.dimension_semantics<parallel>, #tpu.dimension_semantics<arbitrary>], iteration_bounds = array<i64: 2, 1, 1>, scalar_prefetch = 0 : i64, scratch_operands = 1 : i64, tpu.core_type = #tpu.core_type<tc>, window_params = [{transform_indices = @transform_0, window_bounds = array<i64: 1, 3, 32, 128>}, {transform_indices = @transform_1, window_bounds = array<i64: 1, 32, 128>}, {transform_indices = @transform_2, window_bounds = array<i64: 1, 1, 3, 2, 128>}]} {
    %c0_i32 = arith.constant 0 : i32
    %0 = arith.cmpi eq, %arg2, %c0_i32 : i32
    %1 = arith.extui %0 : i1 to i32
    %c0_i32_0 = arith.constant 0 : i32
    %2 = arith.cmpi ne, %1, %c0_i32_0 : i32
    scf.if %2 {
      %cst_68 = arith.constant 0.000000e+00 : f32
      %94 = vector.broadcast %cst_68 : f32 to vector<3x2x8x128xf32>
      %c0_69 = arith.constant 0 : index
      %c0_70 = arith.constant 0 : index
      %c0_71 = arith.constant 0 : index
      %c0_72 = arith.constant 0 : index
      %95 = vector.load %arg6[%c0_69, %c0_70, %c0_71, %c0_72] : memref<3x2x8x128xf32, #tpu.memory_space<vmem>>, vector<3x2x8x128xf32>
      tpu.vector_store %arg6[%c0_69, %c0_70, %c0_71, %c0_72], %94 {strides = array<i32>} : memref<3x2x8x128xf32, #tpu.memory_space<vmem>>, vector<3x2x8x128xf32>,
    } else {
    }
    %cst = arith.constant 0.000000e+00 : f32
    %3 = vector.broadcast %cst : f32 to vector<8x128xf32>
    %cst_1 = arith.constant 0.000000e+00 : f32
    %4 = vector.broadcast %cst_1 : f32 to vector<8x128xf32>
    %cst_2 = arith.constant 0.000000e+00 : f32
    %5 = vector.broadcast %cst_2 : f32 to vector<8x128xf32>
    %cst_3 = arith.constant 0.000000e+00 : f32
    %6 = vector.broadcast %cst_3 : f32 to vector<8x128xf32>
    %cst_4 = arith.constant 0.000000e+00 : f32
    %7 = vector.broadcast %cst_4 : f32 to vector<8x128xf32>
    %cst_5 = arith.constant 0.000000e+00 : f32
    %8 = vector.broadcast %cst_5 : f32 to vector<8x128xf32>
    %c0 = arith.constant 0 : index
    %c0_6 = arith.constant 0 : index
    %c0_7 = arith.constant 0 : index
    %c0_8 = arith.constant 0 : index
    %9 = vector.load %arg3[%c0, %c0_6, %c0_7, %c0_8] : memref<1x3x32x128xf32, #tpu.memory_space<vmem>>, vector<1x3x32x128xf32>
    %10 = vector.shape_cast %9 : vector<1x3x32x128xf32> to vector<3x32x128xf32>
    %c0_9 = arith.constant 0 : index
    %c0_10 = arith.constant 0 : index
    %c0_11 = arith.constant 0 : index
    %11 = vector.load %arg4[%c0_9, %c0_10, %c0_11] : memref<1x32x128xi32, #tpu.memory_space<vmem>>, vector<1x32x128xi32>
    %12 = vector.shape_cast %11 : vector<1x32x128xi32> to vector<32x128xi32>
    %cst_12 = arith.constant dense<0xFF800000> : vector<32x128xf32>
    %13 = vector.multi_reduction <maximumf>, %10, %cst_12 [0] : vector<3x32x128xf32> to vector<32x128xf32>
    %14 = vector.shape_cast %13 : vector<32x128xf32> to vector<1x32x128xf32>
    %15 = vector.broadcast %14 : vector<1x32x128xf32> to vector<3x32x128xf32>
    %16 = arith.subf %10, %15 : vector<3x32x128xf32>
    %17 = math.exp %16 : vector<3x32x128xf32>
    %cst_13 = arith.constant dense<0.000000e+00> : vector<32x128xf32>
    %18 = vector.multi_reduction <add>, %17, %cst_13 [0] : vector<3x32x128xf32> to vector<32x128xf32>
    %19 = vector.shape_cast %18 : vector<32x128xf32> to vector<1x32x128xf32>
    %20 = tpu.reciprocal %19 : vector<1x32x128xf32> -> vector<1x32x128xf32>
    %21 = vector.broadcast %20 : vector<1x32x128xf32> to vector<3x32x128xf32>
    %22 = arith.mulf %17, %21 : vector<3x32x128xf32>
    %23 = vector.extract_strided_slice %22 {offsets = [1, 0, 0], sizes = [1, 32, 128], strides = [1, 1, 1]} : vector<3x32x128xf32> to vector<1x32x128xf32>
    %24 = vector.shape_cast %23 : vector<1x32x128xf32> to vector<32x128xf32>
    %c1_i32 = arith.constant 1 : i32
    %25 = vector.broadcast %c1_i32 : i32 to vector<32x128xi32>
    %26 = arith.cmpi eq, %12, %25 : vector<32x128xi32>
    %27 = arith.extui %26 : vector<32x128xi1> to vector<32x128xi32>
    %28 = arith.sitofp %27 : vector<32x128xi32> to vector<32x128xf32>
    %29 = arith.mulf %24, %28 : vector<32x128xf32>
    %30 = vector.shape_cast %29 : vector<32x128xf32> to vector<4x8x128xf32>
    %cst_14 = arith.constant dense<0.000000e+00> : vector<8x128xf32>
    %31 = vector.multi_reduction <add>, %30, %cst_14 [0] : vector<4x8x128xf32> to vector<8x128xf32>
    %32 = arith.addf %3, %31 : vector<8x128xf32>
    %33 = vector.shape_cast %24 : vector<32x128xf32> to vector<4x8x128xf32>
    %cst_15 = arith.constant dense<0.000000e+00> : vector<8x128xf32>
    %34 = vector.multi_reduction <add>, %33, %cst_15 [0] : vector<4x8x128xf32> to vector<8x128xf32>
    %35 = arith.addf %5, %34 : vector<8x128xf32>
    %36 = vector.shape_cast %28 : vector<32x128xf32> to vector<4x8x128xf32>
    %cst_16 = arith.constant dense<0.000000e+00> : vector<8x128xf32>
    %37 = vector.multi_reduction <add>, %36, %cst_16 [0] : vector<4x8x128xf32> to vector<8x128xf32>
    %38 = arith.addf %7, %37 : vector<8x128xf32>
    %39 = vector.extract_strided_slice %22 {offsets = [2, 0, 0], sizes = [1, 32, 128], strides = [1, 1, 1]} : vector<3x32x128xf32> to vector<1x32x128xf32>
    %40 = vector.shape_cast %39 : vector<1x32x128xf32> to vector<32x128xf32>
    %c2_i32 = arith.constant 2 : i32
    %41 = vector.broadcast %c2_i32 : i32 to vector<32x128xi32>
    %42 = arith.cmpi eq, %12, %41 : vector<32x128xi32>
    %43 = arith.extui %42 : vector<32x128xi1> to vector<32x128xi32>
    %44 = arith.sitofp %43 : vector<32x128xi32> to vector<32x128xf32>
    %45 = arith.mulf %40, %44 : vector<32x128xf32>
    %46 = vector.shape_cast %45 : vector<32x128xf32> to vector<4x8x128xf32>
    %cst_17 = arith.constant dense<0.000000e+00> : vector<8x128xf32>
    %47 = vector.multi_reduction <add>, %46, %cst_17 [0] : vector<4x8x128xf32> to vector<8x128xf32>
    %48 = arith.addf %4, %47 : vector<8x128xf32>
    %49 = vector.shape_cast %40 : vector<32x128xf32> to vector<4x8x128xf32>
    %cst_18 = arith.constant dense<0.000000e+00> : vector<8x128xf32>
    %50 = vector.multi_reduction <add>, %49, %cst_18 [0] : vector<4x8x128xf32> to vector<8x128xf32>
    %51 = arith.addf %6, %50 : vector<8x128xf32>
    %52 = vector.shape_cast %44 : vector<32x128xf32> to vector<4x8x128xf32>
    %cst_19 = arith.constant dense<0.000000e+00> : vector<8x128xf32>
    %53 = vector.multi_reduction <add>, %52, %cst_19 [0] : vector<4x8x128xf32> to vector<8x128xf32>
    %54 = arith.addf %8, %53 : vector<8x128xf32>
    %c0_20 = arith.constant 0 : index
    %c0_21 = arith.constant 0 : index
    %c0_22 = arith.constant 0 : index
    %c0_23 = arith.constant 0 : index
    %55 = vector.load %arg6[%c0_20, %c0_21, %c0_22, %c0_23] : memref<3x2x8x128xf32, #tpu.memory_space<vmem>>, vector<1x1x8x128xf32>
    %56 = vector.shape_cast %55 : vector<1x1x8x128xf32> to vector<8x128xf32>
    %57 = arith.addf %56, %32 : vector<8x128xf32>
    %c0_24 = arith.constant 0 : index
    %c0_25 = arith.constant 0 : index
    %c0_26 = arith.constant 0 : index
    %c0_27 = arith.constant 0 : index
    %58 = vector.load %arg6[%c0_24, %c0_25, %c0_26, %c0_27] : memref<3x2x8x128xf32, #tpu.memory_space<vmem>>, vector<1x1x8x128xf32>
    %59 = vector.shape_cast %58 : vector<1x1x8x128xf32> to vector<8x128xf32>
    %60 = vector.shape_cast %57 : vector<8x128xf32> to vector<1x1x8x128xf32>
    tpu.vector_store %arg6[%c0_24, %c0_25, %c0_26, %c0_27], %60 {strides = array<i32>} : memref<3x2x8x128xf32, #tpu.memory_space<vmem>>, vector<1x1x8x128xf32>,
    %c0_28 = arith.constant 0 : index
    %c1 = arith.constant 1 : index
    %c0_29 = arith.constant 0 : index
    %c0_30 = arith.constant 0 : index
    %61 = vector.load %arg6[%c0_28, %c1, %c0_29, %c0_30] : memref<3x2x8x128xf32, #tpu.memory_space<vmem>>, vector<1x1x8x128xf32>
    %62 = vector.shape_cast %61 : vector<1x1x8x128xf32> to vector<8x128xf32>
    %63 = arith.addf %62, %48 : vector<8x128xf32>
    %c0_31 = arith.constant 0 : index
    %c1_32 = arith.constant 1 : index
    %c0_33 = arith.constant 0 : index
    %c0_34 = arith.constant 0 : index
    %64 = vector.load %arg6[%c0_31, %c1_32, %c0_33, %c0_34] : memref<3x2x8x128xf32, #tpu.memory_space<vmem>>, vector<1x1x8x128xf32>
    %65 = vector.shape_cast %64 : vector<1x1x8x128xf32> to vector<8x128xf32>
    %66 = vector.shape_cast %63 : vector<8x128xf32> to vector<1x1x8x128xf32>
    tpu.vector_store %arg6[%c0_31, %c1_32, %c0_33, %c0_34], %66 {strides = array<i32>} : memref<3x2x8x128xf32, #tpu.memory_space<vmem>>, vector<1x1x8x128xf32>,
    %c1_35 = arith.constant 1 : index
    %c0_36 = arith.constant 0 : index
    %c0_37 = arith.constant 0 : index
    %c0_38 = arith.constant 0 : index
    %67 = vector.load %arg6[%c1_35, %c0_36, %c0_37, %c0_38] : memref<3x2x8x128xf32, #tpu.memory_space<vmem>>, vector<1x1x8x128xf32>
    %68 = vector.shape_cast %67 : vector<1x1x8x128xf32> to vector<8x128xf32>
    %69 = arith.addf %68, %35 : vector<8x128xf32>
    %c1_39 = arith.constant 1 : index
    %c0_40 = arith.constant 0 : index
    %c0_41 = arith.constant 0 : index
    %c0_42 = arith.constant 0 : index
    %70 = vector.load %arg6[%c1_39, %c0_40, %c0_41, %c0_42] : memref<3x2x8x128xf32, #tpu.memory_space<vmem>>, vector<1x1x8x128xf32>
    %71 = vector.shape_cast %70 : vector<1x1x8x128xf32> to vector<8x128xf32>
    %72 = vector.shape_cast %69 : vector<8x128xf32> to vector<1x1x8x128xf32>
    tpu.vector_store %arg6[%c1_39, %c0_40, %c0_41, %c0_42], %72 {strides = array<i32>} : memref<3x2x8x128xf32, #tpu.memory_space<vmem>>, vector<1x1x8x128xf32>,
    %c1_43 = arith.constant 1 : index
    %c1_44 = arith.constant 1 : index
    %c0_45 = arith.constant 0 : index
    %c0_46 = arith.constant 0 : index
    %73 = vector.load %arg6[%c1_43, %c1_44, %c0_45, %c0_46] : memref<3x2x8x128xf32, #tpu.memory_space<vmem>>, vector<1x1x8x128xf32>
    %74 = vector.shape_cast %73 : vector<1x1x8x128xf32> to vector<8x128xf32>
    %75 = arith.addf %74, %51 : vector<8x128xf32>
    %c1_47 = arith.constant 1 : index
    %c1_48 = arith.constant 1 : index
    %c0_49 = arith.constant 0 : index
    %c0_50 = arith.constant 0 : index
    %76 = vector.load %arg6[%c1_47, %c1_48, %c0_49, %c0_50] : memref<3x2x8x128xf32, #tpu.memory_space<vmem>>, vector<1x1x8x128xf32>
    %77 = vector.shape_cast %76 : vector<1x1x8x128xf32> to vector<8x128xf32>
    %78 = vector.shape_cast %75 : vector<8x128xf32> to vector<1x1x8x128xf32>
    tpu.vector_store %arg6[%c1_47, %c1_48, %c0_49, %c0_50], %78 {strides = array<i32>} : memref<3x2x8x128xf32, #tpu.memory_space<vmem>>, vector<1x1x8x128xf32>,
    %c2 = arith.constant 2 : index
    %c0_51 = arith.constant 0 : index
    %c0_52 = arith.constant 0 : index
    %c0_53 = arith.constant 0 : index
    %79 = vector.load %arg6[%c2, %c0_51, %c0_52, %c0_53] : memref<3x2x8x128xf32, #tpu.memory_space<vmem>>, vector<1x1x8x128xf32>
    %80 = vector.shape_cast %79 : vector<1x1x8x128xf32> to vector<8x128xf32>
    %81 = arith.addf %80, %38 : vector<8x128xf32>
    %c2_54 = arith.constant 2 : index
    %c0_55 = arith.constant 0 : index
    %c0_56 = arith.constant 0 : index
    %c0_57 = arith.constant 0 : index
    %82 = vector.load %arg6[%c2_54, %c0_55, %c0_56, %c0_57] : memref<3x2x8x128xf32, #tpu.memory_space<vmem>>, vector<1x1x8x128xf32>
    %83 = vector.shape_cast %82 : vector<1x1x8x128xf32> to vector<8x128xf32>
    %84 = vector.shape_cast %81 : vector<8x128xf32> to vector<1x1x8x128xf32>
    tpu.vector_store %arg6[%c2_54, %c0_55, %c0_56, %c0_57], %84 {strides = array<i32>} : memref<3x2x8x128xf32, #tpu.memory_space<vmem>>, vector<1x1x8x128xf32>,
    %c2_58 = arith.constant 2 : index
    %c1_59 = arith.constant 1 : index
    %c0_60 = arith.constant 0 : index
    %c0_61 = arith.constant 0 : index
    %85 = vector.load %arg6[%c2_58, %c1_59, %c0_60, %c0_61] : memref<3x2x8x128xf32, #tpu.memory_space<vmem>>, vector<1x1x8x128xf32>
    %86 = vector.shape_cast %85 : vector<1x1x8x128xf32> to vector<8x128xf32>
    %87 = arith.addf %86, %54 : vector<8x128xf32>
    %c2_62 = arith.constant 2 : index
    %c1_63 = arith.constant 1 : index
    %c0_64 = arith.constant 0 : index
    %c0_65 = arith.constant 0 : index
    %88 = vector.load %arg6[%c2_62, %c1_63, %c0_64, %c0_65] : memref<3x2x8x128xf32, #tpu.memory_space<vmem>>, vector<1x1x8x128xf32>
    %89 = vector.shape_cast %88 : vector<1x1x8x128xf32> to vector<8x128xf32>
    %90 = vector.shape_cast %87 : vector<8x128xf32> to vector<1x1x8x128xf32>
    tpu.vector_store %arg6[%c2_62, %c1_63, %c0_64, %c0_65], %90 {strides = array<i32>} : memref<3x2x8x128xf32, #tpu.memory_space<vmem>>, vector<1x1x8x128xf32>,
    %c0_i32_66 = arith.constant 0 : i32
    %91 = arith.cmpi eq, %arg2, %c0_i32_66 : i32
    %92 = arith.extui %91 : i1 to i32
    %c0_i32_67 = arith.constant 0 : i32
    %93 = arith.cmpi ne, %92, %c0_i32_67 : i32
    scf.if %93 {
      %c0_68 = arith.constant 0 : index
      %c0_69 = arith.constant 0 : index
      %c0_70 = arith.constant 0 : index
      %c0_71 = arith.constant 0 : index
      %94 = vector.load %arg6[%c0_68, %c0_69, %c0_70, %c0_71] : memref<3x2x8x128xf32, #tpu.memory_space<vmem>>, vector<3x2x8x128xf32>
      %cst_72 = arith.constant dense<0.000000e+00> : vector<3x2x128xf32>
      %95 = vector.multi_reduction <add>, %94, %cst_72 [2] : vector<3x2x8x128xf32> to vector<3x2x128xf32>
      %c0_73 = arith.constant 0 : index
      %c0_74 = arith.constant 0 : index
      %c0_75 = arith.constant 0 : index
      %c0_76 = arith.constant 0 : index
      %c0_77 = arith.constant 0 : index
      %96 = vector.load %arg5[%c0_73, %c0_74, %c0_75, %c0_76, %c0_77] : memref<1x1x3x2x128xf32, #tpu.memory_space<vmem>>, vector<1x1x3x2x128xf32>
      %97 = vector.shape_cast %96 : vector<1x1x3x2x128xf32> to vector<3x2x128xf32>
      %98 = vector.shape_cast %95 : vector<3x2x128xf32> to vector<1x1x3x2x128xf32>
      tpu.vector_store %arg5[%c0_73, %c0_74, %c0_75, %c0_76, %c0_77], %98 {strides = array<i32>} : memref<1x1x3x2x128xf32, #tpu.memory_space<vmem>>, vector<1x1x3x2x128xf32>,
    } else {
    }
    return
  }
  func.func @transform_0(%arg0: i32, %arg1: i32, %arg2: i32) -> (i32, i32, i32, i32) {
    %c1_i32 = arith.constant 1 : i32
    %0 = arith.muli %arg1, %c1_i32 : i32
    %1 = arith.addi %0, %arg2 : i32
    %c0_i32 = arith.constant 0 : i32
    %c0_i32_0 = arith.constant 0 : i32
    %c0_i32_1 = arith.constant 0 : i32
    return %arg0, %c0_i32, %1, %c0_i32_0 : i32, i32, i32, i32
  }
  func.func @transform_1(%arg0: i32, %arg1: i32, %arg2: i32) -> (i32, i32, i32) {
    %c1_i32 = arith.constant 1 : i32
    %0 = arith.muli %arg1, %c1_i32 : i32
    %1 = arith.addi %0, %arg2 : i32
    %c0_i32 = arith.constant 0 : i32
    %c0_i32_0 = arith.constant 0 : i32
    return %arg0, %1, %c0_i32 : i32, i32, i32
  }
  func.func @transform_2(%arg0: i32, %arg1: i32, %arg2: i32) -> (i32, i32, i32, i32, i32) {
    %c0_i32 = arith.constant 0 : i32
    %c0_i32_0 = arith.constant 0 : i32
    %c0_i32_1 = arith.constant 0 : i32
    %c0_i32_2 = arith.constant 0 : i32
    return %arg0, %arg1, %c0_i32, %c0_i32_0, %c0_i32_1 : i32, i32, i32, i32, i32
  }
}

</mosaic_0001>

<bundles_post_ra>
// kernel: tpu_custom_call.1
= control target key start
LH: loop header
LB: loop body
LE: loop exit
PB: predicated region body
PF: predicated region fallthrough
CT: control target
= control target key end

     0   :  { %7 = vsyncpa [#allocation4], 0  ;;  %s1189_s0 = inlined_call_operand.hbm [shape: f32[2,3,32,128], index: 0, kind: input, shape index: {}]   ;;  %s1190_s1 = inlined_call_operand.hbm [shape: s32[2,32,128], index: 1, kind: input, shape index: {}]   ;;  %s1191_s2 = inlined_call_operand.hbm [shape: f32[2,1,3,2,128], index: 2, kind: output, shape index: {}]  }
   0x1   :  { %9 = vsyncpa [#allocation4 + $0x1], 0 }
   0x2   :  { %10 = vsyncpa [#allocation7], 0 }
   0x3   :  { %12 = vsyncpa [#allocation7 + $0x1], 0 }
   0x4   :  { %13 = vsyncpa [#allocation5], 0 }
   0x5   :  { %15 = vsyncpa [#allocation5 + $0x1], 0  ;;  %s907_s9 = smov 0   ;;  %s909_s10 = smov 0  }
   0x6   :  { %s911_s11 = smov 0   ;;  %s913_s12 = smov 0  }
   0x7   :  { %s915_s13 = smov 0   ;;  %s917_s14 = smov 0  }
   0x8 LB: > { %s605_s15 = sadd.s32 4294967295, %s882_s14   ;;  %s606_s16 = sadd.s32 4294967294, %s882_s14   ;;  %s882_s14 = sphi %s917_s14, %s21_s14   ;;  %s878_s13 = sphi %s915_s13, %s1209_s13   ;;  %s874_s12 = sphi %s913_s12, %s1208_s12   ;;  %s870_s11 = sphi %s911_s11, %s1207_s11   ;;  %s866_s10 = sphi %s909_s10, %s1206_s10   ;;  %s862_s9 = sphi %s907_s9, %s1205_s9  }
   0x9   : > { %s40_s17 = sadd.s32 1, %s878_s13  ;;  %s51_s18 = sadd.s32 1, %s870_s11 }
   0xa   : > { %p42_p0 = scmp.ge.s32.totalorder %s40_s17, 2  ;;  %p58_p1 = scmp.ne.s32.totalorder %s870_s11, %s866_s10 }
   0xb   : > { %p59_p2 = scmp.eq.s32.totalorder %s882_s14, 0  ;;  %p64_p3 = scmp.ne.s32.totalorder %s866_s10, %s862_s9 }
   0xc   : > { %s1211_s17 = smov (%p42_p0, %s40_s17), 0  ;;  %p65_p5 = scmp.eq.s32.totalorder %s605_s15, 0 }
   0xd   : > { %p948_p4 = por %p59_p2, %p58_p1  ;;  %s46_s20 = ssub.s32 %s878_s13, %s1211_s17 }
   0xe   : > { %p120_p6 = scmp.eq.s32.totalorder %s605_s15, 1  ;;  %p49_p7 = scmp.eq.s32.totalorder %s46_s20, 0 }
   0xf   : > { %p954_p8 = por %p65_p5, %p64_p3  ;;  %p126_p10 = scmp.eq.s32.totalorder %s606_s16, 1 }
  0x10   : > { %p958_p9 = por %p120_p6, %p58_p1  ;;  %p649_p13 = scmp.lt.s32.totalorder %s882_s14, 2 }
  0x11   : > { %s1195_s21 = scalar_select %p954_p8, 1, 0 }
  0x12   : > { %s1196_s22 = scalar_select %p958_p9, 1, 0 }
  0x13   : > { %s963_s23 = scalar_select %p49_p7, %s870_s11, %s51_s18  }
  0x14   : > { %p965_p11 = por %p126_p10, %p64_p3  ;;  %s972_s25 = sand.u32 1, %s870_s11  }
  0x15   : > { %s627_s26 = smul.u32 96, %s972_s25  ;;  %p978_p0 = pnand %p649_p13, %p948_p4 }
  0x16   : > { %s1197_s24 = scalar_select %p965_p11, 1, 0 }
  0x17   : > { %s628_s27 = smul.u32 1536, %s878_s13  ;;  %s150_s4 = scalar_lea.vmem [#allocation3], %s627_s26 }
  0x18   : > { %s160_s5 = sshll.u32 %s150_s4, 4  ;;  %s147_s6 = scalar_lea.sflag [#allocation4], %s972_s25  ;;  %s987_s5 = int_to_ptr.vmem [resolvable:$true] %s160_s5 }
  0x19   : > { %s985_s3 = scalar_lea.hbm %s1189_s0, %s628_s27  ;;  %p738_p3 = pneg %p978_p0 }
  0x1a   : > { %s736_s7 = scalar_lea.hbm %s985_s3, 1536  ;;  %s741_s16 = scalar_lea.hbm %s1189_s0, 3072 }
  0x1b   : > { %p737_p2 = scmp.ne.s32.totalorder %s985_s3, %s736_s7  ;;  %p742_p6 = scmp.lt.u32.totalorder %s985_s3, %s1189_s0 }
  0x1c   : > { %p743_p7 = scmp.lt.u32.totalorder %s741_s16, %s736_s7  ;;  %p745_p13 = scmp.lt.u32.totalorder %s736_s7, %s985_s3 }
  0x1d   : > { %p739_p4 = pnand %p738_p3, %p737_p2 }
  0x1e   : > { %p744_p10 = por %p743_p7, %p742_p6 }
  0x1f   : > { %p740_p5 = pneg %p739_p4 }
  0x20   : > { %p746_p12 = por %p745_p13, %p744_p10 }
  0x22   : > { %p747_p1 = pnand %p746_p12, %p740_p5 }
  0x24   : > { %750 = shalt.err (!%p747_p1)
}
  0x25   : > { %s751_s20 = scalar_lea.vmem %s987_s5, 1536  ;;  %s884_s26 = smov [#allocation3]  }
  0x26   : > { %p752_p2 = scmp.ne.s32.totalorder %s987_s5, %s751_s20  ;;  %s756_s27 = sshll.u32 %s884_s26, 4  ;;  %s757_s27 = int_to_ptr.vmem [resolvable:$false] %s756_s27 }
  0x27   : > { %s758_s29 = scalar_lea.vmem %s757_s27, 3072  ;;  %p759_p9 = scmp.lt.s32.totalorder %s987_s5, %s757_s27 }
  0x28   : > { %p754_p4 = pnand %p752_p2, %p738_p3  ;;  %p760_p6 = scmp.lt.s32.totalorder %s758_s29, %s751_s20 }
  0x2a   : > { %p755_p11 = pneg %p754_p4  ;;  %p761_p7 = por %p760_p6, %p759_p9 }
  0x2c   : > { %p762_p10 = pnand %p761_p7, %p755_p11 }
  0x2e   : > { %765 = shalt.err (!%p762_p10)
}
  0x2f   : > { %s885_s30 = smov 128   ;;  %s886_s4 = smov 8  }
  0x30   : > { %641 = dma.hbm_to_vmem [thread:$0]  (!%p978_p0), %s985_s3, 1536, %s987_s5, %s147_s6, %s885_s30, %s885_s30, %s886_s4  }
  0x31   : > { %p192_p9 = scmp.lt.s32.totalorder %s882_s14, 3  ;;  %s610_s7 = sshll.u32 %s972_s25, 5 }
  0x32   : > { %s626_s8 = sshll.u32 %s878_s13, 9  ;;  %p1199_p11 = scmp.ge.s32.totalorder %s882_s14, 1 }
  0x33   : > { %s1033_s19 = scalar_lea.hbm %s1190_s1, %s626_s8  ;;  %s174_s20 = scalar_lea.vmem [#allocation6], %s610_s7 }
  0x34   : > { %p1026_p12 = pnand %p1199_p11, %p192_p9  ;;  %s184_s26 = sshll.u32 %s174_s20, 4  ;;  %s1035_s26 = int_to_ptr.vmem [resolvable:$true] %s184_s26 }
  0x35   : > { %s171_s3 = scalar_lea.sflag [#allocation7], %s972_s25  ;;  %s766_s5 = scalar_lea.hbm %s1033_s19, 512 }
  0x36   : > { %p767_p1 = scmp.ne.s32.totalorder %s1033_s19, %s766_s5  ;;  %s771_s29 = scalar_lea.hbm %s1190_s1, 1024 }
  0x37   : > { %p772_p2 = scmp.lt.u32.totalorder %s1033_s19, %s1190_s1  ;;  %p773_p4 = scmp.lt.u32.totalorder %s771_s29, %s766_s5 }
  0x38   : > { %p769_p5 = pnand %p767_p1, %p738_p3  ;;  %p775_p7 = scmp.lt.u32.totalorder %s766_s5, %s1033_s19 }
  0x39   : > { %p774_p6 = por %p773_p4, %p772_p2 }
  0x3a   : > { %p770_p13 = pneg %p769_p5 }
  0x3b   : > { %p776_p10 = por %p775_p7, %p774_p6 }
  0x3d   : > { %p777_p9 = pnand %p776_p10, %p770_p13 }
  0x3f   : > { %780 = shalt.err (!%p777_p9)
}
  0x40   : > { %s781_s7 = scalar_lea.vmem %s1035_s26, 512  ;;  %s887_s18 = smov [#allocation6]  }
  0x41   : > { %p782_p11 = scmp.ne.s32.totalorder %s1035_s26, %s781_s7  ;;  %s786_s20 = sshll.u32 %s887_s18, 4  ;;  %s787_s20 = int_to_ptr.vmem [resolvable:$false] %s786_s20 }
  0x42   : > { %s788_s6 = scalar_lea.vmem %s787_s20, 1024  ;;  %p789_p8 = scmp.lt.s32.totalorder %s1035_s26, %s787_s20 }
  0x43   : > { %p784_p1 = pnand %p782_p11, %p738_p3  ;;  %p790_p2 = scmp.lt.s32.totalorder %s788_s6, %s781_s7 }
  0x45   : > { %p785_p5 = pneg %p784_p1  ;;  %p791_p4 = por %p790_p2, %p789_p8 }
  0x47   : > { %p792_p6 = pnand %p791_p4, %p785_p5 }
  0x49   : > { %795 = shalt.err (!%p792_p6)
}
  0x4a   : > { %644 = dma.hbm_to_vmem [thread:$0]  (!%p978_p0), %s1033_s19, 512, %s1035_s26, %s171_s3, %s885_s30, %s885_s30, %s886_s4  }
  0x4b   : > { %196 = sbr.rel (%p1026_p12) target bundleno = 167 (0xa7), region = 28  ;;  %s1069_s5 = sand.u32 (!%p1026_p12), 1, %s866_s10  }
  0x4c   : > { %s629_s27 = smul.u32 (!%p1026_p12), 96, %s1069_s5  ;;  %s199_s29 = scalar_lea.sflag (!%p1026_p12), [#allocation4], %s1069_s5 }
  0x4d   : > { %p1201_p8 = scmp.ne.s32.totalorder (!%p1026_p12), %s1195_s21, 0 }
  0x4e   : > { %s202_s28 = scalar_lea.vmem (!%p1026_p12), [#allocation3], %s629_s27 }
  0x52   : > { %849 = dma.done.wait (%p1201_p8), %s199_s29, 1536  }
  0x53   : > { %851 = vsyncadd (%p1201_p8), %s199_s29, 4294965760  ;;  %s614_s25 = sshll.u32 %s1069_s5, 5  ;;  %s208_s30 = scalar_lea.sflag [#allocation7], %s1069_s5 }
  0x54   : > { %s1079_s4 = scalar_lea.vmem [#allocation6], %s614_s25 }
  0x55   : > { %853 = dma.done.wait (%p1201_p8), %s208_s30, 512  }
  0x56   : > { %855 = vsyncadd (%p1201_p8), %s208_s30, 4294966784  ;;  %v251_v0 = vld [vmem:[%s202_s28] sm:$0xff]  ;;  %v252_v1 = vld [vmem:[%s202_s28 + $0x8] sm:$0xff]  ;;  %v888_v48 = vmov 0.0   ;;  %s630_s21 = smul.u32 6, %s1069_s5  ;;  %vm461_vm8 = vcmask 1041409  }
  0x57   : > { %v253_v2 = vld [vmem:[%s202_s28 + $0x10] sm:$0xff]  ;;  %v254_v3 = vld [vmem:[%s202_s28 + $0x18] sm:$0xff]  ;;  %v255_v4 = vld [vmem:[%s202_s28 + $0x20] sm:$0xff]  ;;  %s631_s19 = smul.u32 96, %s874_s12  ;;  %s472_s12 = scalar_lea.sflag [#allocation5], %s1069_s5 }
  0x58   : > { %v256_v5 = vld [vmem:[%s202_s28 + $0x28] sm:$0xff]  ;;  %v257_v6 = vld [vmem:[%s202_s28 + $0x30] sm:$0xff]  ;;  %v258_v7 = vld [vmem:[%s202_s28 + $0x38] sm:$0xff]  ;;  %v267_v9 = vmax.f32 %v251_v0, %v255_v4  ;;  %s1118_s15 = scalar_lea.vmem [#allocation8], %s630_s21  ;;  %p1202_p3 = scmp.ne.s32.totalorder %s1196_s22, 0 }
  0x59   : > { %v259_v8 = vld [vmem:[%s202_s28 + $0x40] sm:$0xff]  ;;  %v269_v10 = vmax.f32 %v252_v1, %v256_v5  ;;  %v260_v11 = vld [vmem:[%s202_s28 + $0x48] sm:$0xff]  ;;  %v261_v12 = vld [vmem:[%s202_s28 + $0x50] sm:$0xff]  ;;  %v271_v14 = vmax.f32 %v253_v2, %v257_v6  ;;  %v273_v15 = vmax.f32 %v254_v3, %v258_v7  ;;  %s487_s26 = sshll.u32 %s1118_s15, 4  ;;  %s1137_s16 = scalar_lea.hbm %s1191_s2, %s631_s19  ;;  %s1131_s26 = int_to_ptr.vmem [resolvable:$true] %s487_s26 }
  0x5a   : > { %v262_v13 = vld [vmem:[%s202_s28 + $0x58] sm:$0xff]  ;;  %v268_v16 = vmax.f32 %v267_v9, %v259_v8  ;;  %v263_v25 = vld [vmem:[%s1079_s4] sm:$0xff]  ;;  %v264_v26 = vld [vmem:[%s1079_s4 + $0x8] sm:$0xff]  ;;  %s796_s7 = scalar_lea.vmem %s1131_s26, 96  ;;  %s889_s18 = smov [#allocation8]  }
  0x5b   : > { %v270_v17 = vmax.f32 %v269_v10, %v260_v11  ;;  %v272_v18 = vmax.f32 %v271_v14, %v261_v12  ;;  %v274_v19 = vmax.f32 %v273_v15, %v262_v13  ;;  %v265_v38 = vld [vmem:[%s1079_s4 + $0x10] sm:$0xff]  ;;  %vm331_vm0 = vcmp.eq.s32.totalorder %v263_v25, 1  ;;  %v266_v40 = vld [vmem:[%s1079_s4 + $0x18] sm:$0xff]  ;;  %p797_p0 = scmp.ne.s32.totalorder %s1131_s26, %s796_s7  ;;  %s800_s20 = sshll.u32 %s889_s18, 4  ;;  %s801_s20 = int_to_ptr.vmem [resolvable:$false] %s800_s20 }
  0x5c   : > { %v275_v20 = vsub.f32 %v251_v0, %v268_v16  ;;  %v279_v24 = vsub.f32 %v255_v4, %v268_v16  ;;  %v283_v30 = vsub.f32 %v259_v8, %v268_v16  ;;  %vm332_vm1 = vcmp.eq.s32.totalorder %v264_v26, 1  ;;  %s802_s6 = scalar_lea.vmem %s801_s20, 192  ;;  %p803_p7 = scmp.lt.s32.totalorder %s1131_s26, %s801_s20 }
  0x5d   : > { %v276_v21 = vsub.f32 %v252_v1, %v270_v17  ;;  %v277_v22 = vsub.f32 %v253_v2, %v272_v18  ;;  %v278_v23 = vsub.f32 %v254_v3, %v274_v19  ;;  %v280_v27 = vsub.f32 %v256_v5, %v270_v17  ;;  %p798_p12 = pnand %p797_p0, %p1202_p3  ;;  %p804_p10 = scmp.lt.s32.totalorder %s802_s6, %s796_s7 }
  0x5e   : > { %v281_v28 = vsub.f32 %v257_v6, %v272_v18  ;;  %v282_v29 = vsub.f32 %v258_v7, %v274_v19  ;;  %v284_v31 = vsub.f32 %v260_v11, %v270_v17  ;;  %v287_v32 = vmul.f32 1.442695, %v275_v20 }
  0x5f   : > { %v289_v33 = vmul.f32 1.442695, %v276_v21  ;;  %v291_v34 = vmul.f32 1.442695, %v277_v22  ;;  %v285_v35 = vsub.f32 %v261_v12, %v272_v18  ;;  %v286_v36 = vsub.f32 %v262_v13, %v274_v19  ;;  %p799_p13 = pneg %p798_p12  ;;  %p805_p9 = por %p804_p10, %p803_p7 }
  0x60   : > { %v293_v37 = vmul.f32 1.442695, %v278_v23  ;;  %704 = vpow2.f32 %v287_v32  ;;  %v295_v39 = vmul.f32 1.442695, %v279_v24  ;;  %v297_v41 = vmul.f32 1.442695, %v280_v27 }
  0x61   : > { %706 = vpow2.f32 %v289_v33  ;;  %v299_v42 = vmul.f32 1.442695, %v281_v28  ;;  %v301_v43 = vmul.f32 1.442695, %v282_v29  ;;  %v303_v44 = vmul.f32 1.442695, %v283_v30  ;;  %p806_p11 = pnand %p805_p9, %p799_p13 }
  0x62   : > { %708 = vpow2.f32 %v291_v34  ;;  %v305_v45 = vmul.f32 1.442695, %v284_v31  ;;  %v307_v46 = vmul.f32 1.442695, %v285_v35  ;;  %v309_v47 = vmul.f32 1.442695, %v286_v36 }
  0x63   : > { %710 = vpow2.f32 %v293_v37  ;;  %vm333_vm2 = vcmp.eq.s32.totalorder %v265_v38, 1  ;;  %vm334_vm3 = vcmp.eq.s32.totalorder %v266_v40, 1  ;;  %vm359_vm4 = vcmp.eq.s32.totalorder %v263_v25, 2 }
  0x64   : > { %712 = vpow2.f32 %v295_v39  ;;  %vm360_vm5 = vcmp.eq.s32.totalorder %v264_v26, 2  ;;  %v1090_v49 = vsel %vm331_vm0, 1.0, %v888_v48  ;;  %v1093_v50 = vsel %vm332_vm1, 1.0, %v888_v48 }
  0x65   : > { %714 = vpow2.f32 %v297_v41  ;;  %vm361_vm6 = vcmp.eq.s32.totalorder %v265_v38, 2  ;;  %v1095_v51 = vsel %vm359_vm4, 1.0, %v888_v48  ;;  %v1097_v52 = vsel %vm360_vm5, 1.0, %v888_v48 }
  0x66   : > { %716 = vpow2.f32 %v299_v42  ;;  %v355_v53 = vadd.f32 %v1093_v50, %v1090_v49  ;;  %v1101_v54 = vsel %vm333_vm2, 1.0, %v888_v48  ;;  %vm362_vm7 = vcmp.eq.s32.totalorder %v266_v40, 2 }
  0x67   : > { %718 = vpow2.f32 %v301_v43  ;;  %v383_v55 = vadd.f32 %v1097_v52, %v1095_v51  ;;  %v1105_v56 = vsel %vm361_vm6, 1.0, %v888_v48  ;;  %v1109_v58 = vsel %vm334_vm3, 1.0, %v888_v48 }
  0x68   : > { %720 = vpow2.f32 %v303_v44  ;;  %v356_v57 = vadd.f32 %v1101_v54, %v355_v53  ;;  %v1112_v61 = vsel %vm362_vm7, 1.0, %v888_v48 }
  0x69   : > { %722 = vpow2.f32 %v305_v45  ;;  %v384_v59 = vadd.f32 %v1105_v56, %v383_v55 }
  0x6a   : > { %v705_v60 = vpop.eup %704  ;;  %724 = vpow2.f32 %v307_v46  ;;  %v357_v62 = vadd.f32 %v1109_v58, %v356_v57 }
  0x6b   : > { %v707_v63 = vpop.eup %706  ;;  %726 = vpow2.f32 %v309_v47  ;;  %v385_v0 = vadd.f32 %v1112_v61, %v384_v59 }
  0x6c   : > { %v709_v1 = vpop.eup %708  ;;  %v443_v2 = vrot.slane %v357_v62, 4 }
  0x6d   : > { %v711_v3 = vpop.eup %710  ;;  %v449_v4 = vrot.slane %v385_v0, 4 }
  0x6e   : > { %v713_v5 = vpop.eup %712  ;;  %v444_v6 = vadd.f32 %v443_v2, %v357_v62 }
  0x6f   : > { %v715_v7 = vpop.eup %714  ;;  %v311_v8 = vadd.f32 %v713_v5, %v705_v60  ;;  %v450_v9 = vadd.f32 %v449_v4, %v385_v0 }
  0x70   : > { %v717_v10 = vpop.eup %716  ;;  %v313_v11 = vadd.f32 %v715_v7, %v707_v63  ;;  %v445_v12 = vrot.slane %v444_v6, 2 }
  0x71   : > { %v719_v13 = vpop.eup %718  ;;  %v315_v14 = vadd.f32 %v717_v10, %v709_v1  ;;  %v451_v15 = vrot.slane %v450_v9, 2 }
  0x72   : > { %v721_v16 = vpop.eup %720  ;;  %v317_v17 = vadd.f32 %v719_v13, %v711_v3  ;;  %v446_v18 = vadd.f32 %v445_v12, %v444_v6 }
  0x73   : > { %v723_v19 = vpop.eup %722  ;;  %v312_v20 = vadd.f32 %v721_v16, %v311_v8  ;;  %v452_v21 = vadd.f32 %v451_v15, %v450_v9 }
  0x74   : > { %v725_v22 = vpop.eup %724  ;;  %v314_v23 = vadd.f32 %v723_v19, %v313_v11  ;;  %v447_v24 = vrot.slane %v446_v18, 1 }
  0x75   : > { %v727_v25 = vpop.eup %726  ;;  %v316_v26 = vadd.f32 %v725_v22, %v315_v14  ;;  %728 = vrcp.f32 %v312_v20  ;;  %v453_v27 = vrot.slane %v452_v21, 1 }
  0x76   : > { %v318_v28 = vadd.f32 %v727_v25, %v317_v17  ;;  %730 = vrcp.f32 %v314_v23  ;;  %v448_v29 = vadd.f32 %v447_v24, %v446_v18 }
  0x77   : > { %732 = vrcp.f32 %v316_v26  ;;  %v454_v30 = vadd.f32 %v453_v27, %v452_v21 }
  0x78   : > { %734 = vrcp.f32 %v318_v28 }
  0x79   : > { %v464_v31 = vsel %vm461_vm8, %v454_v30, %v448_v29 }
  0x7a   : > { %470 = vst [vmem:[%s1118_s15 + $0x4] sm:$0x3] %v464_v31 }
  0x7f   : > { %v729_v32 = vpop.eup %728 }
  0x80   : > { %v731_v33 = vpop.eup %730  ;;  %v323_v34 = vmul.f32 %v729_v32, %v713_v5  ;;  %v327_v35 = vmul.f32 %v729_v32, %v721_v16 }
  0x81   : > { %v733_v36 = vpop.eup %732  ;;  %v324_v37 = vmul.f32 %v731_v33, %v715_v7  ;;  %v328_v38 = vmul.f32 %v731_v33, %v723_v19 }
  0x82   : > { %v735_v39 = vpop.eup %734  ;;  %v325_v40 = vmul.f32 %v733_v36, %v717_v10  ;;  %v329_v41 = vmul.f32 %v733_v36, %v725_v22  ;;  %v343_v42 = vmul.f32 %v1090_v49, %v323_v34  ;;  %v371_v43 = vmul.f32 %v1095_v51, %v327_v35 }
  0x83   : > { %v326_v44 = vmul.f32 %v735_v39, %v719_v13  ;;  %v330_v45 = vmul.f32 %v735_v39, %v727_v25  ;;  %v344_v46 = vmul.f32 %v1093_v50, %v324_v37  ;;  %v372_v47 = vmul.f32 %v1097_v52, %v328_v38 }
  0x84   : > { %v345_v48 = vmul.f32 %v1101_v54, %v325_v40  ;;  %v373_v53 = vmul.f32 %v1105_v56, %v329_v41  ;;  %v351_v55 = vadd.f32 %v324_v37, %v323_v34  ;;  %v379_v57 = vadd.f32 %v328_v38, %v327_v35 }
  0x85   : > { %v346_v59 = vmul.f32 %v1109_v58, %v326_v44  ;;  %v347_v60 = vadd.f32 %v344_v46, %v343_v42  ;;  %v374_v62 = vmul.f32 %v1112_v61, %v330_v45  ;;  %v375_v49 = vadd.f32 %v372_v47, %v371_v43 }
  0x86   : > { %v352_v63 = vadd.f32 %v351_v55, %v325_v40  ;;  %v380_v51 = vadd.f32 %v379_v57, %v329_v41 }
  0x87   : > { %v348_v0 = vadd.f32 %v347_v60, %v345_v48  ;;  %v376_v1 = vadd.f32 %v375_v49, %v373_v53 }
  0x88   : > { %v353_v2 = vadd.f32 %v352_v63, %v326_v44  ;;  %v381_v50 = vadd.f32 %v380_v51, %v330_v45 }
  0x89   : > { %v349_v3 = vadd.f32 %v348_v0, %v346_v59  ;;  %v377_v52 = vadd.f32 %v376_v1, %v374_v62 }
  0x8a   : > { %v431_v4 = vrot.slane %v353_v2, 4  ;;  %v437_v54 = vrot.slane %v381_v50, 4 }
  0x8b   : > { %v419_v5 = vrot.slane %v349_v3, 4  ;;  %v425_v56 = vrot.slane %v377_v52, 4 }
  0x8c   : > { %v432_v6 = vadd.f32 %v431_v4, %v353_v2  ;;  %v438_v7 = vadd.f32 %v437_v54, %v381_v50 }
  0x8d   : > { %v420_v58 = vadd.f32 %v419_v5, %v349_v3  ;;  %v426_v8 = vadd.f32 %v425_v56, %v377_v52 }
  0x8e   : > { %v433_v61 = vrot.slane %v432_v6, 2  ;;  %v439_v9 = vrot.slane %v438_v7, 2 }
  0x8f   : > { %v421_v10 = vrot.slane %v420_v58, 2  ;;  %v427_v11 = vrot.slane %v426_v8, 2 }
  0x90   : > { %v434_v12 = vadd.f32 %v433_v61, %v432_v6  ;;  %v440_v13 = vadd.f32 %v439_v9, %v438_v7 }
  0x91   : > { %v422_v14 = vadd.f32 %v421_v10, %v420_v58  ;;  %v428_v15 = vadd.f32 %v427_v11, %v426_v8 }
  0x92   : > { %v435_v16 = vrot.slane %v434_v12, 1  ;;  %v441_v17 = vrot.slane %v440_v13, 1 }
  0x93   : > { %v423_v18 = vrot.slane %v422_v14, 1  ;;  %v429_v19 = vrot.slane %v428_v15, 1 }
  0x94   : > { %v436_v20 = vadd.f32 %v435_v16, %v434_v12  ;;  %v442_v21 = vadd.f32 %v441_v17, %v440_v13 }
  0x95   : > { %v424_v22 = vadd.f32 %v423_v18, %v422_v14  ;;  %v430_v23 = vadd.f32 %v429_v19, %v428_v15 }
  0x96   : > { %v463_v24 = vsel %vm461_vm8, %v442_v21, %v436_v20 }
  0x97   : > { %v462_v25 = vsel %vm461_vm8, %v430_v23, %v424_v22  ;;  %469 = vst [vmem:[%s1118_s15 + $0x2] sm:$0x3] %v463_v24 }
  0x98   : > { %468 = vst [vmem:[%s1118_s15] sm:$0x3] %v462_v25 }
  0x99   : > { %809 = shalt.err (!%p806_p11)
}
  0x9a   : > { %s810_s27 = scalar_lea.hbm %s1137_s16, 96  ;;  %s814_s25 = scalar_lea.hbm %s1191_s2, 192 }
  0x9b   : > { %p811_p1 = scmp.ne.s32.totalorder %s1137_s16, %s810_s27  ;;  %p815_p4 = scmp.lt.u32.totalorder %s1137_s16, %s1191_s2 }
  0x9c   : > { %p816_p6 = scmp.lt.u32.totalorder %s814_s25, %s810_s27  ;;  %p818_p0 = scmp.lt.u32.totalorder %s810_s27, %s1137_s16 }
  0x9d   : > { %p812_p5 = pnand %p811_p1, %p1202_p3 }
  0x9e   : > { %p817_p8 = por %p816_p6, %p815_p4 }
  0x9f   : > { %p813_p2 = pneg %p812_p5 }
  0xa0   : > { %p819_p12 = por %p818_p0, %p817_p8 }
  0xa2   : > { %p820_p13 = pnand %p819_p12, %p813_p2 }
  0xa4   : > { %823 = shalt.err (!%p820_p13)
}
  0xa5   : > { %s890_s21 = smov 32   ;;  %s891_s15 = smov 2  }
  0xa6   : > { %636 = dma.vmem_to_hbm [thread:$0]  (%p1202_p3), %s1131_s26, 96, %s1137_s16, %s472_s12, %s890_s21, %s890_s21, %s891_s15  }
  0xa7 PF: > { %s502_s19 = sand.u32 1, %s862_s9   ;;  %p1203_p7 = scmp.ne.s32.totalorder %s1197_s24, 0 }
  0xa8   : > { %p1204_p10 = scmp.ge.s32.totalorder %s882_s14, 2  ;;  %s503_s3 = scalar_lea.sflag [#allocation5], %s502_s19 }
  0xaa   : > { %p646_p9 = pnand %p1204_p10, %p1203_p7 }
  0xac   : > { %857 = dma.done.wait (!%p646_p9), %s503_s3, 96  }
  0xad   : > { %859 = vsyncadd (!%p646_p9), %s503_s3, 4294967200  ;;  %s21_s14 = sadd.s32 1, %s882_s14   ;;  %s1205_s9 = smov %s866_s10 }
  0xae   : > { %p18_p11 = scmp.ge.s32.totalorder %s21_s14, 4   ;;  %s1206_s10 = smov %s870_s11 }
  0xaf   : > { %s1207_s11 = smov %s963_s23  ;;  %s1208_s12 = smov %s878_s13 }
  0xb0   : > { %s1209_s13 = smov %s1211_s17  ;;  %20 = sbr.rel (!%p18_p11) target bundleno = 8 (0x8), region = 99 }
  0xb7   :  { %508 = vsyncpa [#allocation4], 1 }
  0xb8   :  { %510 = vsyncpa [#allocation4 + $0x1], 1 }
  0xb9   :  { %511 = vsyncpa [#allocation7], 1 }
  0xba   :  { %513 = vsyncpa [#allocation7 + $0x1], 1 }
  0xbb   :  { %514 = vsyncpa [#allocation5], 1 }
  0xbc   :  { %516 = vsyncpa [#allocation5 + $0x1], 1 }

</bundles_post_ra>
